<compile_context>
chip_gen: v6e
topology: v6e:2x2x1
jax: 0.10.0
libtpu: 0.0.40
codegen_flags: <defaults>
</compile_context>

<pallas_src>
import jax
import jax.numpy as jnp
from jax.experimental import pallas as pl
from jax.experimental.pallas import tpu as pltpu


def _round_up(n, m):
    return ((n + m - 1) // m) * m


def _mlp_kernel(x_ref, w1_ref, b1_ref, w2_ref, b2_ref, w3r_ref, b3_ref, o_ref):
    # x_ref: (TB, D_in) bf16 | w1: (D_in, 64) bf16 | w2: (64, 32) bf16
    # b1: (1, 64) f32 | b2: (1, 32) f32 | w3r: (1, 32) f32 | b3: (1, 1) f32
    x = x_ref[...]

    # layer1: Linear(D_in -> 64) + ReLU  (MXU, f32 accumulation)
    h1 = jnp.dot(x, w1_ref[...], preferred_element_type=jnp.float32) + b1_ref[...]
    h1 = jnp.maximum(h1, 0.0)

    # layer2: Linear(64 -> 32) + ReLU  (MXU, bf16 inputs, f32 accumulation)
    h2 = jnp.dot(h1.astype(jnp.bfloat16), w2_ref[...],
                 preferred_element_type=jnp.float32) + b2_ref[...]
    h2 = jnp.maximum(h2, 0.0)

    # layer3: Linear(32 -> 1). N=1 matmul would use 1 MXU output column; do it
    # as a VPU multiply + lane reduction (XLU) instead.
    z = jnp.sum(h2 * w3r_ref[...], axis=-1, keepdims=True) + b3_ref[...]

    o_ref[...] = jax.nn.sigmoid(z) * 100.0


def exercise_prediction_forward(x, params, *, block_b=2048):
    """x: [B, input_dim] float32. params: dict of w1,b1,w2,b2,w3,b3."""
    B, d_in = x.shape
    w1, b1 = params["w1"], params["b1"]
    w2, b2 = params["w2"], params["b2"]
    w3, b3 = params["w3"], params["b3"]

    # bf16 streaming operands (kernel is HBM-bound); biases / w3-row stay f32.
    x_bf = x.astype(jnp.bfloat16)
    w1_bf = w1.astype(jnp.bfloat16)
    w2_bf = w2.astype(jnp.bfloat16)
    w3_row = w3.T.astype(jnp.float32)  # (1, 32)

    # Batch tile: big enough to amortize per-grid-step overhead, multiple of 8
    # sublanes, shrunk for small batches. A 2048-row bf16 tile is ~128 KiB, so
    # double-buffered tiles fit trivially in VMEM on v5e/v6e/v7x.
    tb = min(block_b, _round_up(B, 8))
    b_pad = _round_up(B, tb)
    if b_pad != B:
        x_bf = jnp.pad(x_bf, ((0, b_pad - B), (0, 0)))

    grid = (b_pad // tb,)

    out = pl.pallas_call(
        _mlp_kernel,
        out_shape=jax.ShapeDtypeStruct((b_pad, 1), jnp.float32),
        grid=grid,
        in_specs=[
            pl.BlockSpec((tb, d_in), lambda i: (i, 0)),    # x: streamed per tile
            pl.BlockSpec((d_in, 64), lambda i: (0, 0)),    # weights/biases: resident
            pl.BlockSpec((1, 64), lambda i: (0, 0)),
            pl.BlockSpec((64, 32), lambda i: (0, 0)),
            pl.BlockSpec((1, 32), lambda i: (0, 0)),
            pl.BlockSpec((1, 32), lambda i: (0, 0)),
            pl.BlockSpec((1, 1), lambda i: (0, 0)),
        ],
        out_specs=pl.BlockSpec((tb, 1), lambda i: (i, 0)),
        compiler_params=pltpu.CompilerParams(
            dimension_semantics=("parallel",),  # shard batch tiles across TCs (v7x)
        ),
    )(x_bf, w1_bf, b1, w2_bf, b2, w3_row, b3)

    return out[:B]


def init_params(key, input_dim):
    """Deterministic init mimicking PyTorch's default Linear init
    (uniform(-1/sqrt(fan_in), 1/sqrt(fan_in)))."""
    def linear(k, fan_in, fan_out):
        kw, kb = jax.random.split(k)
        bound = 1.0 / jnp.sqrt(fan_in)
        # stored as (in, out): transpose of PyTorch's (out, in) weight
        w = jax.random.uniform(kw, (fan_in, fan_out), jnp.float32, -bound, bound)
        b = jax.random.uniform(kb, (1, fan_out), jnp.float32, -bound, bound)
        return w, b

    k1, k2, k3 = jax.random.split(key, 3)
    w1, b1 = linear(k1, input_dim, 64)
    w2, b2 = linear(k2, 64, 32)
    w3, b3 = linear(k3, 32, 1)
    return {"w1": w1, "b1": b1, "w2": w2, "b2": b2, "w3": w3, "b3": b3}


def _reference_forward_bf16(x, p):
    """Pure-JAX reference with the same bf16 input precision as the kernel."""
    xb = x.astype(jnp.bfloat16)
    w1b = p["w1"].astype(jnp.bfloat16)
    w2b = p["w2"].astype(jnp.bfloat16)
    h1 = jnp.maximum(
        jnp.dot(xb, w1b, preferred_element_type=jnp.float32) + p["b1"], 0.0)
    h2 = jnp.maximum(
        jnp.dot(h1.astype(jnp.bfloat16), w2b,
                preferred_element_type=jnp.float32) + p["b2"], 0.0)
    z = jnp.sum(h2 * p["w3"].T, axis=-1, keepdims=True) + p["b3"]
    return jax.nn.sigmoid(z) * 100.0


if __name__ == "__main__":
    key = jax.random.PRNGKey(0)
    k_in, k_par = jax.random.split(key)

    batch, input_dim = 12, 32  # non-multiple-of-8 batch exercises the padding path
    x = jax.random.normal(k_in, (batch, input_dim), jnp.float32)
    params = init_params(k_par, input_dim)

    out = exercise_prediction_forward(x, params)
    out = jax.block_until_ready(out)

    ref = _reference_forward_bf16(x, params)
    assert out.shape == (batch, 1), out.shape
    assert bool(jnp.all(jnp.isfinite(out))), "non-finite output"
    assert jnp.allclose(out, ref, atol=0.15, rtol=1e-2), (out, ref)

    print("KERNEL_OK")
</pallas_src>

<mosaic_0001>
module attributes {stable_mosaic.version = 11 : i64} {
  func.func @_mlp_kernel(%arg0: i32, %arg1: memref<16x32xbf16, #tpu.memory_space<vmem>>, %arg2: memref<32x64xbf16, #tpu.memory_space<vmem>>, %arg3: memref<1x64xf32, #tpu.memory_space<vmem>>, %arg4: memref<64x32xbf16, #tpu.memory_space<vmem>>, %arg5: memref<1x32xf32, #tpu.memory_space<vmem>>, %arg6: memref<1x32xf32, #tpu.memory_space<vmem>>, %arg7: memref<1x1xf32, #tpu.memory_space<vmem>>, %arg8: memref<16x1xf32, #tpu.memory_space<vmem>>) attributes {dimension_semantics = [#tpu.dimension_semantics<parallel>], iteration_bounds = array<i64: 1>, scalar_prefetch = 0 : i64, scratch_operands = 0 : i64, tpu.core_type = #tpu.core_type<tc>, window_params = [{transform_indices = @transform_0, window_bounds = array<i64: 16, 32>}, {pipeline_mode = #tpu.pipeline_mode<synchronous>, transform_indices = @transform_1, window_bounds = array<i64: 32, 64>}, {pipeline_mode = #tpu.pipeline_mode<synchronous>, transform_indices = @transform_2, window_bounds = array<i64: 1, 64>}, {pipeline_mode = #tpu.pipeline_mode<synchronous>, transform_indices = @transform_3, window_bounds = array<i64: 64, 32>}, {pipeline_mode = #tpu.pipeline_mode<synchronous>, transform_indices = @transform_4, window_bounds = array<i64: 1, 32>}, {pipeline_mode = #tpu.pipeline_mode<synchronous>, transform_indices = @transform_5, window_bounds = array<i64: 1, 32>}, {pipeline_mode = #tpu.pipeline_mode<synchronous>, transform_indices = @transform_6, window_bounds = array<i64: 1, 1>}, {transform_indices = @transform_7, window_bounds = array<i64: 16, 1>}]} {
    %c0 = arith.constant 0 : index
    %c0_0 = arith.constant 0 : index
    %0 = vector.load %arg1[%c0, %c0_0] : memref<16x32xbf16, #tpu.memory_space<vmem>>, vector<16x32xbf16>
    %c0_1 = arith.constant 0 : index
    %c0_2 = arith.constant 0 : index
    %1 = vector.load %arg2[%c0_1, %c0_2] : memref<32x64xbf16, #tpu.memory_space<vmem>>, vector<32x64xbf16>
    %cst = arith.constant dense<0.000000e+00> : vector<16x64xf32>
    %2 = tpu.matmul %0, %1, %cst {dimension_numbers = #tpu.dot_dimension_numbers<[1], [0], [0], [1], [0, 0, 1, 1], [], []>} : vector<16x32xbf16>, vector<32x64xbf16>, vector<16x64xf32> -> vector<16x64xf32>
    %c0_3 = arith.constant 0 : index
    %c0_4 = arith.constant 0 : index
    %3 = vector.load %arg3[%c0_3, %c0_4] : memref<1x64xf32, #tpu.memory_space<vmem>>, vector<1x64xf32>
    %4 = vector.broadcast %3 : vector<1x64xf32> to vector<16x64xf32>
    %5 = arith.addf %2, %4 : vector<16x64xf32>
    %cst_5 = arith.constant 0.000000e+00 : f32
    %6 = vector.broadcast %cst_5 : f32 to vector<16x64xf32>
    %7 = arith.maximumf %5, %6 : vector<16x64xf32>
    %8 = arith.truncf %7 : vector<16x64xf32> to vector<16x64xbf16>
    %c0_6 = arith.constant 0 : index
    %c0_7 = arith.constant 0 : index
    %9 = vector.load %arg4[%c0_6, %c0_7] : memref<64x32xbf16, #tpu.memory_space<vmem>>, vector<64x32xbf16>
    %cst_8 = arith.constant dense<0.000000e+00> : vector<16x32xf32>
    %10 = tpu.matmul %8, %9, %cst_8 {dimension_numbers = #tpu.dot_dimension_numbers<[1], [0], [0], [1], [0, 0, 1, 1], [], []>} : vector<16x64xbf16>, vector<64x32xbf16>, vector<16x32xf32> -> vector<16x32xf32>
    %c0_9 = arith.constant 0 : index
    %c0_10 = arith.constant 0 : index
    %11 = vector.load %arg5[%c0_9, %c0_10] : memref<1x32xf32, #tpu.memory_space<vmem>>, vector<1x32xf32>
    %12 = vector.broadcast %11 : vector<1x32xf32> to vector<16x32xf32>
    %13 = arith.addf %10, %12 : vector<16x32xf32>
    %cst_11 = arith.constant 0.000000e+00 : f32
    %14 = vector.broadcast %cst_11 : f32 to vector<16x32xf32>
    %15 = arith.maximumf %13, %14 : vector<16x32xf32>
    %c0_12 = arith.constant 0 : index
    %c0_13 = arith.constant 0 : index
    %16 = vector.load %arg6[%c0_12, %c0_13] : memref<1x32xf32, #tpu.memory_space<vmem>>, vector<1x32xf32>
    %17 = vector.broadcast %16 : vector<1x32xf32> to vector<16x32xf32>
    %18 = arith.mulf %15, %17 : vector<16x32xf32>
    %cst_14 = arith.constant dense<0.000000e+00> : vector<16xf32>
    %19 = vector.multi_reduction <add>, %18, %cst_14 [1] : vector<16x32xf32> to vector<16xf32>
    %20 = vector.shape_cast %19 : vector<16xf32> to vector<16x1xf32>
    %c0_15 = arith.constant 0 : index
    %c0_16 = arith.constant 0 : index
    %21 = vector.load %arg7[%c0_15, %c0_16] : memref<1x1xf32, #tpu.memory_space<vmem>>, vector<1x1xf32>
    %22 = vector.broadcast %21 : vector<1x1xf32> to vector<16x1xf32>
    %23 = arith.addf %20, %22 : vector<16x1xf32>
    %24 = arith.negf %23 : vector<16x1xf32>
    %25 = math.exp %24 : vector<16x1xf32>
    %cst_17 = arith.constant 1.000000e+00 : f32
    %26 = vector.broadcast %cst_17 : f32 to vector<16x1xf32>
    %27 = arith.addf %26, %25 : vector<16x1xf32>
    %28 = arith.divf %26, %27 : vector<16x1xf32>
    %cst_18 = arith.constant 1.000000e+02 : f32
    %29 = vector.broadcast %cst_18 : f32 to vector<16x1xf32>
    %30 = arith.mulf %28, %29 : vector<16x1xf32>
    %c0_19 = arith.constant 0 : index
    %c0_20 = arith.constant 0 : index
    %31 = vector.load %arg8[%c0_19, %c0_20] : memref<16x1xf32, #tpu.memory_space<vmem>>, vector<16x1xf32>
    tpu.vector_store %arg8[%c0_19, %c0_20], %30 {strides = array<i32>} : memref<16x1xf32, #tpu.memory_space<vmem>>, vector<16x1xf32>,
    return
  }
  func.func @transform_0(%arg0: i32) -> (i32, i32) {
    %c0_i32 = arith.constant 0 : i32
    %c0_i32_0 = arith.constant 0 : i32
    return %arg0, %c0_i32 : i32, i32
  }
  func.func @transform_1(%arg0: i32) -> (i32, i32) {
    %c0_i32 = arith.constant 0 : i32
    %c0_i32_0 = arith.constant 0 : i32
    %c0_i32_1 = arith.constant 0 : i32
    return %c0_i32, %c0_i32_0 : i32, i32
  }
  func.func @transform_2(%arg0: i32) -> (i32, i32) {
    %c0_i32 = arith.constant 0 : i32
    %c0_i32_0 = arith.constant 0 : i32
    %c0_i32_1 = arith.constant 0 : i32
    return %c0_i32, %c0_i32_0 : i32, i32
  }
  func.func @transform_3(%arg0: i32) -> (i32, i32) {
    %c0_i32 = arith.constant 0 : i32
    %c0_i32_0 = arith.constant 0 : i32
    %c0_i32_1 = arith.constant 0 : i32
    return %c0_i32, %c0_i32_0 : i32, i32
  }
  func.func @transform_4(%arg0: i32) -> (i32, i32) {
    %c0_i32 = arith.constant 0 : i32
    %c0_i32_0 = arith.constant 0 : i32
    %c0_i32_1 = arith.constant 0 : i32
    return %c0_i32, %c0_i32_0 : i32, i32
  }
  func.func @transform_5(%arg0: i32) -> (i32, i32) {
    %c0_i32 = arith.constant 0 : i32
    %c0_i32_0 = arith.constant 0 : i32
    %c0_i32_1 = arith.constant 0 : i32
    return %c0_i32, %c0_i32_0 : i32, i32
  }
  func.func @transform_6(%arg0: i32) -> (i32, i32) {
    %c0_i32 = arith.constant 0 : i32
    %c0_i32_0 = arith.constant 0 : i32
    %c0_i32_1 = arith.constant 0 : i32
    return %c0_i32, %c0_i32_0 : i32, i32
  }
  func.func @transform_7(%arg0: i32) -> (i32, i32) {
    %c0_i32 = arith.constant 0 : i32
    %c0_i32_0 = arith.constant 0 : i32
    return %arg0, %c0_i32 : i32, i32
  }
}

</mosaic_0001>

<bundles_post_ra>
// kernel: tpu_custom_call.1
= control target key start
LH: loop header
LB: loop body
LE: loop exit
PB: predicated region body
PF: predicated region fallthrough
CT: control target
= control target key end

     0   :  { %v298_v0 = vmov 0.0   ;;  %vm299_vm0 = vmmov 0   ;;  %vm59_vm1 = vcmask 261120   ;;  %vm146_vm2 = vcmask 523264   ;;  %s382_s1 = inlined_call_operand.vmem [shape: bf16[32,64], index: 1, kind: input, shape index: {}]   ;;  %s383_s3 = inlined_call_operand.vmem [shape: bf16[64,32], index: 3, kind: input, shape index: {}]   ;;  %s384_s0 = inlined_call_operand.vmem [shape: bf16[16,32], index: 0, kind: input, shape index: {}]   ;;  %s385_s2 = inlined_call_operand.vmem [shape: f32[1,64], index: 2, kind: input, shape index: {}]   ;;  %s386_s6 = inlined_call_operand.<no memory space> [shape: f32[1,1], index: 6, kind: input, shape index: {}]   ;;  %s387_s4 = inlined_call_operand.vmem [shape: f32[1,32], index: 4, kind: input, shape index: {}]   ;;  %s388_s5 = inlined_call_operand.vmem [shape: f32[1,32], index: 5, kind: input, shape index: {}]   ;;  %s389_s7 = inlined_call_operand.vmem [shape: f32[16,1], index: 7, kind: output, shape index: {}]  }
   0x1   :  { %261 = vmatprep.subr.bf16.mxu0 %v298_v0  ;;  %v283_v1 = vld [vmem:[%s382_s1 + $0x8] sm:$0xff]   ;;  %265 = vmatprep.mubr.msk.bf16.mxu0 %vm299_vm0, %v298_v0  ;;  %v284_v2 = vld [vmem:[%s382_s1] sm:$0xff]   ;;  %v286_v3 = vld [vmem:[%s383_s3 + $0x18] sm:$0xff]   ;;  %v12_v18 = vstv %s386_s6  ;;  %vm231_vm3 = vcmask 7168  }
   0x2   :  { %269 = vmatprep.subr.bf16.mxu1 %v298_v0  ;;  %277 = vmatprep.mubr.msk.bf16.mxu1 %vm299_vm0, %v298_v0  ;;  %v285_v4 = vld [vmem:[%s384_s0] sm:$0xff]   ;;  %v287_v5 = vld [vmem:[%s383_s3 + $0x10] sm:$0xff]   ;;  %v288_v6 = vld [vmem:[%s383_s3 + $0x8] sm:$0xff]   ;;  %13 = vst [vmem:[#allocation2] sm:$0x1] %v12_v18 }
   0x3   :  { %262 = vmatpush3.bf16.msra.mxu0 %v283_v1  ;;  %270 = vmatpush3.bf16.msra.mxu1 %v286_v3  ;;  %v289_v7 = vld [vmem:[%s383_s3] sm:$0xff]  }
   0x4   :  { %263 = vmatprep.subr.bf16.mxu0 %v298_v0  ;;  %271 = vmatprep.subr.bf16.mxu1 %v298_v0  ;;  %v238_v8 = vld [vmem:[%s385_s2] ss:$0 sm:$0xff] }
   0x5   :  { %v243_v19 = vld [vmem:[%s387_s4] ss:$0 sm:$0xff] }
   0x6   :  { %v249_v23 = vld [vmem:[%s388_s5] ss:$0 sm:$0xff] }
   0x7   :  { %264 = vmatpush3.bf16.msra.mxu0 %v284_v2  ;;  %272 = vmatpush3.bf16.msra.mxu1 %v287_v5 }
   0x8   :  { %273 = vmatprep.subr.bf16.mxu1 %v298_v0 }
   0x9   :  { %v250_v33 = vld [vmem:[#allocation2] ss:$0 sm:$0xff] }
   0xa   :  { %266 = vmatmul.mubr.msk.bf16.vlgmr.msra.gmra.mxu0 %vm59_vm1, %v285_v4 }
   0xb   :  { %274 = vmatpush3.bf16.msra.mxu1 %v288_v6 }
   0xc   :  { %275 = vmatprep.subr.bf16.mxu1 %v298_v0 }
   0xf   :  { %276 = vmatpush3.bf16.msra.mxu1 %v289_v7 }
  0xca   :  { %v97_v9 = vpop.f32.mrf.mxu0 }
  0xcb   :  { %v98_v11 = vadd.f32 %v238_v8, %v97_v9 }
  0xcc   :  { %v267_v10 = vpop.f32.mrf.mxu0 }
  0xcd   :  { %v104_v15 = vmax.f32 %v98_v11, 0.0 }
  0xce   :  { %v100_v12 = vpop.f32.mrf.mxu0 }
  0xcf   :  { %v101_v13 = vadd.f32 %v238_v8, %v100_v12 }
  0xd0   :  { %v268_v14 = vpop.f32.mrf.mxu0 }
  0xd1   :  { %v105_v16 = vmax.f32 %v101_v13, 0.0 }
  0xd3   :  { %v106_v17 = vpack.c.bf16 %v105_v16, %v104_v15 }
  0xd5   :  { %278 = vmatmul.mubr.msk.bf16.vlgmr.msra.gmra.mxu1 %vm146_vm2, %v106_v17 }
 0x195   :  { %v184_v20 = vpop.f32.mrf.mxu1 }
 0x196   :  { %v185_v21 = vadd.f32 %v243_v19, %v184_v20 }
 0x197   :  { %v279_v22 = vpop.f32.mrf.mxu1 }
 0x198   :  { %v191_v24 = vmax.f32 %v185_v21, 0.0 }
 0x199   :  { %v187_v25 = vpop.f32.mrf.mxu1 }
 0x19a   :  { %v188_v26 = vadd.f32 %v243_v19, %v187_v25  ;;  %v200_v27 = vmul.f32 %v249_v23, %v191_v24 }
 0x19b   :  { %v280_v28 = vpop.f32.mrf.mxu1 }
 0x19c   :  { %v192_v29 = vmax.f32 %v188_v26, 0.0  ;;  %v202_v30 = vsel %vm59_vm1, %v200_v27, 0.0 }
 0x19d   :  { %203 = vadd.xlane.f32.xlu0 %v202_v30 }
 0x19e   :  { %v201_v31 = vmul.f32 %v249_v23, %v192_v29 }
 0x1a0   :  { %v205_v32 = vsel %vm59_vm1, %v201_v31, 0.0 }
 0x1a1   :  { %206 = vadd.xlane.f32.xlu0 %v205_v32 }
 0x226   :  { %v204_v34 = vpop.xlane.xlu0 %203 }
 0x227   :  { %v215_v35 = vadd.f32 %v250_v33, %v204_v34 }
 0x229   :  { %v251_v36 = vmul.f32 -1.442695, %v215_v35 }
 0x22a   :  { %v207_v37 = vpop.xlane.xlu0 %206 }
 0x22b   :  { %290 = vpow2.f32 %v251_v36  ;;  %v216_v38 = vadd.f32 %v250_v33, %v207_v37 }
 0x22d   :  { %v252_v39 = vmul.f32 -1.442695, %v216_v38 }
 0x22f   :  { %292 = vpow2.f32 %v252_v39 }
 0x238   :  { %v291_v40 = vpop.eup %290 }
 0x239   :  { %v223_v41 = vadd.f32 1.0, %v291_v40 }
 0x23b   :  { %294 = vrcp.f32 %v223_v41 }
 0x23c   :  { %v293_v42 = vpop.eup %292 }
 0x23d   :  { %v224_v43 = vadd.f32 1.0, %v293_v42 }
 0x23f   :  { %296 = vrcp.f32 %v224_v43 }
 0x248   :  { %v295_v44 = vpop.eup %294 }
 0x249   :  { %v229_v45 = vmul.f32 100.0, %v295_v44 }
 0x24b   :  { %232 = vst.msk [vmem:[%s389_s7] sm:$0xff] %vm231_vm3, %v229_v45 }
 0x24c   :  { %v297_v46 = vpop.eup %296 }
 0x24d   :  { %v230_v47 = vmul.f32 100.0, %v297_v46 }
 0x24f   :  { %233 = vst.msk [vmem:[%s389_s7 + $0x8] sm:$0xff] %vm231_vm3, %v230_v47 }

</bundles_post_ra>
